<compile_context>
chip_gen: v7x
topology: tpu7x:2x2x1
jax: 0.10.0
libtpu: 0.0.40
codegen_flags: <defaults>
</compile_context>

<pallas_src>
import functools

import jax
import jax.numpy as jnp
from jax.experimental import pallas as pl
from jax.experimental.pallas import tpu as pltpu

STATE_DIM = 16
ACTION_DIM = 4
HIDDEN = 128
DEFAULT_TILE_B = 1024   # per-step overhead dominates at small tiles; VMEM is a non-issue
MIN_TILE_B = 256        # MXU M fill on v6e/v7x; multiple of 128 for v5e


def _round_up(x, m):
    return ((x + m - 1) // m) * m


def mlp_kernel(x_ref, w1_ref, b1_ref, w2_ref, b2_ref, w3_ref, b3_ref, o_ref):
    # x arrives f32 straight from HBM; cast to bf16 in-kernel (VPU, free) so the
    # wrapper never materializes a second copy of x.  f32 accumulation on MXU,
    # f32 bias-add + ReLU on VPU, intermediates materialized as bf16 only.
    x = x_ref[...].astype(jnp.bfloat16)
    h1 = jnp.dot(x, w1_ref[...], preferred_element_type=jnp.float32)
    h1 = jnp.maximum(h1 + b1_ref[...], 0.0).astype(jnp.bfloat16)
    h2 = jnp.dot(h1, w2_ref[...], preferred_element_type=jnp.float32)
    h2 = jnp.maximum(h2 + b2_ref[...], 0.0).astype(jnp.bfloat16)
    out = jnp.dot(h2, w3_ref[...], preferred_element_type=jnp.float32)
    o_ref[...] = (out + b3_ref[...]).astype(o_ref.dtype)


def prepare_params(params):
    """One-time parameter prep, hoisted out of the per-call path:
    bf16 weights for the MXU, f32 biases for the VPU bias-add."""
    w1, b1, w2, b2, w3, b3 = params
    return (w1.astype(jnp.bfloat16), b1.astype(jnp.float32),
            w2.astype(jnp.bfloat16), b2.astype(jnp.float32),
            w3.astype(jnp.bfloat16), b3.astype(jnp.float32))


@functools.partial(jax.jit, static_argnames=("tile_b",))
def net_forward(x, prepared_params, tile_b=DEFAULT_TILE_B):
    """Pallas forward pass of Net. x: [B, STATE_DIM] f32 -> [B, ACTION_DIM] f32."""
    w1b, b1, w2b, b2, w3b, b3 = prepared_params
    B = x.shape[0]

    # Batch tile: multiple of 16 (bf16 intermediate packing); for large batches
    # cap it so there are >= 2 grid steps (both v7x TensorCores get work).
    # No wrapper-side pad: Pallas masks the partial last block.
    b16 = _round_up(B, 16)
    tb = min(tile_b, b16)
    if b16 >= 2 * MIN_TILE_B:
        tb = min(tb, max(MIN_TILE_B, _round_up(b16 // 2, MIN_TILE_B)))
    grid = (pl.cdiv(B, tb),)

    const = lambda i: (0, 0)   # weights/biases: single block, VMEM-resident across grid

    flops = 2 * B * (STATE_DIM * HIDDEN + HIDDEN * HIDDEN + HIDDEN * ACTION_DIM)
    bytes_accessed = (
        x.size * 4
        + (w1b.size + w2b.size + w3b.size) * 2
        + (b1.size + b2.size + b3.size) * 4
        + B * ACTION_DIM * 4)

    out = pl.pallas_call(
        mlp_kernel,
        out_shape=jax.ShapeDtypeStruct((B, ACTION_DIM), jnp.float32),
        grid=grid,
        in_specs=[
            pl.BlockSpec((tb, STATE_DIM), lambda i: (i, 0)),    # x tile (f32)
            pl.BlockSpec((STATE_DIM, HIDDEN), const),           # w1 (bf16)
            pl.BlockSpec((1, HIDDEN), const),                   # b1 (f32)
            pl.BlockSpec((HIDDEN, HIDDEN), const),              # w2 (bf16)
            pl.BlockSpec((1, HIDDEN), const),                   # b2 (f32)
            pl.BlockSpec((HIDDEN, ACTION_DIM), const),          # w3 (bf16)
            pl.BlockSpec((1, ACTION_DIM), const),               # b3 (f32)
        ],
        out_specs=pl.BlockSpec((tb, ACTION_DIM), lambda i: (i, 0)),
        compiler_params=pltpu.CompilerParams(
            dimension_semantics=("parallel",)),
        cost_estimate=pl.CostEstimate(
            flops=flops, transcendentals=0, bytes_accessed=bytes_accessed),
    )(x, w1b, b1, w2b, b2, w3b, b3)

    return out


def init_params(key):
    """Weights ~ N(0, 0.1) (as in the PyTorch module); biases use the PyTorch
    nn.Linear default U(-1/sqrt(fan_in), 1/sqrt(fan_in)).
    Weights stored as [in_features, out_features]."""
    k1, k2, k3, kb1, kb2, kb3 = jax.random.split(key, 6)
    w1 = 0.1 * jax.random.normal(k1, (STATE_DIM, HIDDEN), jnp.float32)
    w2 = 0.1 * jax.random.normal(k2, (HIDDEN, HIDDEN), jnp.float32)
    w3 = 0.1 * jax.random.normal(k3, (HIDDEN, ACTION_DIM), jnp.float32)
    b1 = jax.random.uniform(kb1, (1, HIDDEN), jnp.float32,
                            -1.0 / jnp.sqrt(STATE_DIM), 1.0 / jnp.sqrt(STATE_DIM))
    b2 = jax.random.uniform(kb2, (1, HIDDEN), jnp.float32,
                            -1.0 / jnp.sqrt(HIDDEN), 1.0 / jnp.sqrt(HIDDEN))
    b3 = jax.random.uniform(kb3, (1, ACTION_DIM), jnp.float32,
                            -1.0 / jnp.sqrt(HIDDEN), 1.0 / jnp.sqrt(HIDDEN))
    return w1, b1, w2, b2, w3, b3


def reference_forward(x, params):
    w1, b1, w2, b2, w3, b3 = params
    h1 = jnp.maximum(x @ w1 + b1, 0.0)
    h2 = jnp.maximum(h1 @ w2 + b2, 0.0)
    return h2 @ w3 + b3


if __name__ == "__main__":
    key = jax.random.PRNGKey(0)
    k_param, k_x = jax.random.split(key)
    params = init_params(k_param)
    dev_params = prepare_params(params)   # one-time prep (bf16 weight casts)

    B = 8
    x = jax.random.normal(k_x, (B, STATE_DIM), jnp.float32)

    out = net_forward(x, dev_params)
    out = jax.block_until_ready(out)

    ref = reference_forward(x, params)
    assert out.shape == (B, ACTION_DIM)
    # bf16 MXU operands with f32 accumulation -> loosened tolerance vs f32 ref.
    assert jnp.allclose(out, ref, atol=2e-2, rtol=2e-2), (
        f"max abs err {jnp.max(jnp.abs(out - ref))}")

    print("KERNEL_OK")
</pallas_src>

<mosaic_0001>
module attributes {stable_mosaic.version = 11 : i64} {
  func.func @mlp_kernel(%arg0: i32, %arg1: memref<16x16xf32, #tpu.memory_space<vmem>>, %arg2: memref<16x128xbf16, #tpu.memory_space<vmem>>, %arg3: memref<1x128xf32, #tpu.memory_space<vmem>>, %arg4: memref<128x128xbf16, #tpu.memory_space<vmem>>, %arg5: memref<1x128xf32, #tpu.memory_space<vmem>>, %arg6: memref<128x4xbf16, #tpu.memory_space<vmem>>, %arg7: memref<1x4xf32, #tpu.memory_space<vmem>>, %arg8: memref<16x4xf32, #tpu.memory_space<vmem>>) attributes {dimension_semantics = [#tpu.dimension_semantics<parallel>], iteration_bounds = array<i64: 1>, scalar_prefetch = 0 : i64, scratch_operands = 0 : i64, tpu.core_type = #tpu.core_type<tc>, window_params = [{transform_indices = @transform_0, window_bounds = array<i64: 16, 16>}, {pipeline_mode = #tpu.pipeline_mode<synchronous>, transform_indices = @transform_1, window_bounds = array<i64: 16, 128>}, {pipeline_mode = #tpu.pipeline_mode<synchronous>, transform_indices = @transform_2, window_bounds = array<i64: 1, 128>}, {pipeline_mode = #tpu.pipeline_mode<synchronous>, transform_indices = @transform_3, window_bounds = array<i64: 128, 128>}, {pipeline_mode = #tpu.pipeline_mode<synchronous>, transform_indices = @transform_4, window_bounds = array<i64: 1, 128>}, {pipeline_mode = #tpu.pipeline_mode<synchronous>, transform_indices = @transform_5, window_bounds = array<i64: 128, 4>}, {pipeline_mode = #tpu.pipeline_mode<synchronous>, transform_indices = @transform_6, window_bounds = array<i64: 1, 4>}, {transform_indices = @transform_7, window_bounds = array<i64: 16, 4>}]} {
    %c0 = arith.constant 0 : index
    %c0_0 = arith.constant 0 : index
    %0 = vector.load %arg1[%c0, %c0_0] : memref<16x16xf32, #tpu.memory_space<vmem>>, vector<16x16xf32>
    %1 = arith.truncf %0 : vector<16x16xf32> to vector<16x16xbf16>
    %c0_1 = arith.constant 0 : index
    %c0_2 = arith.constant 0 : index
    %2 = vector.load %arg2[%c0_1, %c0_2] : memref<16x128xbf16, #tpu.memory_space<vmem>>, vector<16x128xbf16>
    %cst = arith.constant dense<0.000000e+00> : vector<16x128xf32>
    %3 = tpu.matmul %1, %2, %cst {dimension_numbers = #tpu.dot_dimension_numbers<[1], [0], [0], [1], [0, 0, 1, 1], [], []>} : vector<16x16xbf16>, vector<16x128xbf16>, vector<16x128xf32> -> vector<16x128xf32>
    %c0_3 = arith.constant 0 : index
    %c0_4 = arith.constant 0 : index
    %4 = vector.load %arg3[%c0_3, %c0_4] : memref<1x128xf32, #tpu.memory_space<vmem>>, vector<1x128xf32>
    %5 = vector.broadcast %4 : vector<1x128xf32> to vector<16x128xf32>
    %6 = arith.addf %3, %5 : vector<16x128xf32>
    %cst_5 = arith.constant 0.000000e+00 : f32
    %7 = vector.broadcast %cst_5 : f32 to vector<16x128xf32>
    %8 = arith.maximumf %6, %7 : vector<16x128xf32>
    %9 = arith.truncf %8 : vector<16x128xf32> to vector<16x128xbf16>
    %c0_6 = arith.constant 0 : index
    %c0_7 = arith.constant 0 : index
    %10 = vector.load %arg4[%c0_6, %c0_7] : memref<128x128xbf16, #tpu.memory_space<vmem>>, vector<128x128xbf16>
    %cst_8 = arith.constant dense<0.000000e+00> : vector<16x128xf32>
    %11 = tpu.matmul %9, %10, %cst_8 {dimension_numbers = #tpu.dot_dimension_numbers<[1], [0], [0], [1], [0, 0, 1, 1], [], []>} : vector<16x128xbf16>, vector<128x128xbf16>, vector<16x128xf32> -> vector<16x128xf32>
    %c0_9 = arith.constant 0 : index
    %c0_10 = arith.constant 0 : index
    %12 = vector.load %arg5[%c0_9, %c0_10] : memref<1x128xf32, #tpu.memory_space<vmem>>, vector<1x128xf32>
    %13 = vector.broadcast %12 : vector<1x128xf32> to vector<16x128xf32>
    %14 = arith.addf %11, %13 : vector<16x128xf32>
    %cst_11 = arith.constant 0.000000e+00 : f32
    %15 = vector.broadcast %cst_11 : f32 to vector<16x128xf32>
    %16 = arith.maximumf %14, %15 : vector<16x128xf32>
    %17 = arith.truncf %16 : vector<16x128xf32> to vector<16x128xbf16>
    %c0_12 = arith.constant 0 : index
    %c0_13 = arith.constant 0 : index
    %18 = vector.load %arg6[%c0_12, %c0_13] : memref<128x4xbf16, #tpu.memory_space<vmem>>, vector<128x4xbf16>
    %cst_14 = arith.constant dense<0.000000e+00> : vector<16x4xf32>
    %19 = tpu.matmul %17, %18, %cst_14 {dimension_numbers = #tpu.dot_dimension_numbers<[1], [0], [0], [1], [0, 0, 1, 1], [], []>} : vector<16x128xbf16>, vector<128x4xbf16>, vector<16x4xf32> -> vector<16x4xf32>
    %c0_15 = arith.constant 0 : index
    %c0_16 = arith.constant 0 : index
    %20 = vector.load %arg7[%c0_15, %c0_16] : memref<1x4xf32, #tpu.memory_space<vmem>>, vector<1x4xf32>
    %21 = vector.broadcast %20 : vector<1x4xf32> to vector<16x4xf32>
    %22 = arith.addf %19, %21 : vector<16x4xf32>
    %c0_17 = arith.constant 0 : index
    %c0_18 = arith.constant 0 : index
    %23 = vector.load %arg8[%c0_17, %c0_18] : memref<16x4xf32, #tpu.memory_space<vmem>>, vector<16x4xf32>
    tpu.vector_store %arg8[%c0_17, %c0_18], %22 {strides = array<i32>} : memref<16x4xf32, #tpu.memory_space<vmem>>, vector<16x4xf32>,
    return
  }
  func.func @transform_0(%arg0: i32) -> (i32, i32) {
    %c0_i32 = arith.constant 0 : i32
    %c0_i32_0 = arith.constant 0 : i32
    return %arg0, %c0_i32 : i32, i32
  }
  func.func @transform_1(%arg0: i32) -> (i32, i32) {
    %c0_i32 = arith.constant 0 : i32
    %c0_i32_0 = arith.constant 0 : i32
    %c0_i32_1 = arith.constant 0 : i32
    return %c0_i32, %c0_i32_0 : i32, i32
  }
  func.func @transform_2(%arg0: i32) -> (i32, i32) {
    %c0_i32 = arith.constant 0 : i32
    %c0_i32_0 = arith.constant 0 : i32
    %c0_i32_1 = arith.constant 0 : i32
    return %c0_i32, %c0_i32_0 : i32, i32
  }
  func.func @transform_3(%arg0: i32) -> (i32, i32) {
    %c0_i32 = arith.constant 0 : i32
    %c0_i32_0 = arith.constant 0 : i32
    %c0_i32_1 = arith.constant 0 : i32
    return %c0_i32, %c0_i32_0 : i32, i32
  }
  func.func @transform_4(%arg0: i32) -> (i32, i32) {
    %c0_i32 = arith.constant 0 : i32
    %c0_i32_0 = arith.constant 0 : i32
    %c0_i32_1 = arith.constant 0 : i32
    return %c0_i32, %c0_i32_0 : i32, i32
  }
  func.func @transform_5(%arg0: i32) -> (i32, i32) {
    %c0_i32 = arith.constant 0 : i32
    %c0_i32_0 = arith.constant 0 : i32
    %c0_i32_1 = arith.constant 0 : i32
    return %c0_i32, %c0_i32_0 : i32, i32
  }
  func.func @transform_6(%arg0: i32) -> (i32, i32) {
    %c0_i32 = arith.constant 0 : i32
    %c0_i32_0 = arith.constant 0 : i32
    %c0_i32_1 = arith.constant 0 : i32
    return %c0_i32, %c0_i32_0 : i32, i32
  }
  func.func @transform_7(%arg0: i32) -> (i32, i32) {
    %c0_i32 = arith.constant 0 : i32
    %c0_i32_0 = arith.constant 0 : i32
    return %arg0, %c0_i32 : i32, i32
  }
}

</mosaic_0001>

<bundles_post_ra>
// kernel: net_forward.1
= control target key start
LH: loop header
LB: loop body
LE: loop exit
PB: predicated region body
PF: predicated region fallthrough
CT: control target
= control target key end

     0   :  { %12 = vsyncpa [#allocation3], 0  ;;  %s511_s24 = smov [#allocation2]   ;;  %s657_s0 = inlined_call_operand.vmem [shape: f32[8,16], index: 0, kind: input, shape index: {}]   ;;  %s658_s1 = inlined_call_operand.hbm [shape: bf16[16,128], index: 1, kind: input, shape index: {}]   ;;  %s659_s2 = inlined_call_operand.vmem [shape: f32[1,128], index: 2, kind: input, shape index: {}]   ;;  %s660_s3 = inlined_call_operand.vmem [shape: bf16[128,128], index: 3, kind: input, shape index: {}]   ;;  %s661_s4 = inlined_call_operand.vmem [shape: f32[1,128], index: 4, kind: input, shape index: {}]   ;;  %s662_s5 = inlined_call_operand.vmem [shape: bf16[128,4], index: 5, kind: input, shape index: {}]   ;;  %s663_s6 = inlined_call_operand.vmem [shape: f32[1,4], index: 6, kind: input, shape index: {}]   ;;  %s664_s7 = inlined_call_operand.vmem [shape: f32[8,4], index: 7, kind: output, shape index: {}]  }
   0x1   :  { %s20_s25 = sshll.u32 %s511_s24, 4  ;;  %s487_s28 = scalar_lea.hbm %s658_s1, 128  ;;  %s21_s25 = int_to_ptr.vmem [resolvable:$true] %s20_s25 }
   0x2   :  { %p488_p0 = scmp.ne.s32.totalorder %s658_s1, %s487_s28  ;;  %p491_p1 = scmp.lt.u32.totalorder %s487_s28, %s658_s1 }
   0x4   :  { %p493_p2 = pnand %p491_p1, %p488_p0 }
   0x6   :  { %496 = shalt.err (!%p493_p2)
}
   0x7   :  { %s497_s10 = scalar_lea.vmem %s21_s25, 128  ;;  %p502_p4 = scmp.lt.s32.totalorder %s21_s25, %s21_s25 }
   0x8   :  { %p498_p3 = scmp.ne.s32.totalorder %s21_s25, %s497_s10  ;;  %p503_p5 = scmp.lt.s32.totalorder %s497_s10, %s497_s10 }
   0xa   :  { %p504_p6 = por %p503_p5, %p502_p4 }
   0xc   :  { %p505_p7 = pnand %p504_p6, %p498_p3 }
   0xe   :  { %508 = shalt.err (!%p505_p7)
}
   0xf   :  { %s512_s11 = smov 64   ;;  %s513_s12 = smov 4  }
  0x10   :  { %26 = dma.hbm_to_vmem [thread:$0]  %s658_s1, 128, %s21_s25, [#allocation3], %s512_s11, %s512_s11, %s513_s12  }
  0x11   :  { %509 = dma.done.wait [#allocation3], 128  }
  0x12   :  { %510 = vsyncadd [#allocation3], 4294967168  ;;  %v514_v0 = vmov 0.0   ;;  %vm515_vm0 = vmmov 0   ;;  %v470_v1 = vld [vmem:[#allocation2] sm:$0xff]   ;;  %v42_v3 = vld [vmem:[%s657_s0 + $0x8] sm:$0xff] }
  0x13   :  { %419 = vmatprep.subr.bf16.mxu0 %v514_v0  ;;  %421 = vmatprep.mubr.msk.bf16.mxu0 %vm515_vm0, %v514_v0  ;;  %v41_v2 = vld [vmem:[%s657_s0] sm:$0xff]  ;;  %vm59_vm1 = vcmask 130048   ;;  %v472_v6 = vld [vmem:[%s660_s3 + $0x8] sm:$0xff]   ;;  %v473_v7 = vld [vmem:[%s660_s3 + $0x10] sm:$0xff]   ;;  %vm334_vm2 = vcmask 31744  }
  0x14   :  { %425 = vmatprep.subr.bf16.mxu1 %v514_v0  ;;  %441 = vmatprep.mubr.msk.bf16.mxu1 %vm515_vm0, %v514_v0  ;;  %v43_v4 = vpack.c.bf16 %v42_v3, %v41_v2  ;;  %v471_v5 = vld [vmem:[%s660_s3] sm:$0xff]   ;;  %v474_v8 = vld [vmem:[%s660_s3 + $0x18] sm:$0xff]   ;;  %v476_v10 = vld [vmem:[%s660_s3 + $0x28] sm:$0xff]  }
  0x15   :  { %420 = vmatpush3.bf16.msra.mxu0 %v470_v1  ;;  %426 = vmatpush3.bf16.msra.mxu1 %v471_v5  ;;  %v475_v9 = vld [vmem:[%s660_s3 + $0x20] sm:$0xff]   ;;  %v477_v11 = vld [vmem:[%s660_s3 + $0x30] sm:$0xff]   ;;  %v478_v12 = vld [vmem:[%s660_s3 + $0x38] sm:$0xff]  }
  0x16   :  { %445 = vmatprep.subr.bf16.mxu0 %v514_v0  ;;  %427 = vmatprep.subr.bf16.mxu1 %v514_v0  ;;  %v479_v13 = vld [vmem:[%s662_s5] sm:$0xff]   ;;  %v480_v14 = vld [vmem:[%s662_s5 + $0x8] sm:$0xff]   ;;  %v481_v15 = vld [vmem:[%s662_s5 + $0x10] sm:$0xff]  }
  0x17   :  { %v482_v16 = vld [vmem:[%s662_s5 + $0x18] sm:$0xff]   ;;  %v483_v17 = vld [vmem:[%s662_s5 + $0x20] sm:$0xff]   ;;  %v484_v18 = vld [vmem:[%s662_s5 + $0x28] sm:$0xff]  }
  0x18   :  { %422 = vmatmul.mubr.msk.bf16.vlgmr.msra.gmra.mrb[0].mxu0 %vm59_vm1, %v43_v4  ;;  %v378_v19 = vld [vmem:[%s659_s2] ss:$0 sm:$0xff]  ;;  %v485_v29 = vld [vmem:[%s662_s5 + $0x30] sm:$0xff]   ;;  %v486_v30 = vld [vmem:[%s662_s5 + $0x38] sm:$0xff]  }
  0x19   :  { %461 = vmatprep.mubr.msk.bf16.mxu0 %vm515_vm0, %v514_v0  ;;  %428 = vmatpush3.bf16.msra.mxu1 %v472_v6  ;;  %v381_v31 = vld [vmem:[%s661_s4] ss:$0 sm:$0xff] }
  0x1a   :  { %429 = vmatprep.subr.bf16.mxu1 %v514_v0  ;;  %446 = vmatpush3.bf16.msra.mxu0 %v479_v13  ;;  %v390_v41 = vld [vmem:[%s663_s6] ss:$0 sm:$0xff] }
  0x1b   :  { %447 = vmatprep.subr.bf16.mxu0 %v514_v0 }
  0x1d   :  { %430 = vmatpush3.bf16.msra.mxu1 %v473_v7 }
  0x1e   :  { %431 = vmatprep.subr.bf16.mxu1 %v514_v0  ;;  %448 = vmatpush3.bf16.msra.mxu0 %v480_v14 }
  0x1f   :  { %449 = vmatprep.subr.bf16.mxu0 %v514_v0 }
  0x21   :  { %432 = vmatpush3.bf16.msra.mxu1 %v474_v8 }
  0x22   :  { %433 = vmatprep.subr.bf16.mxu1 %v514_v0  ;;  %450 = vmatpush3.bf16.msra.mxu0 %v481_v15 }
  0x23   :  { %451 = vmatprep.subr.bf16.mxu0 %v514_v0 }
  0x25   :  { %434 = vmatpush3.bf16.msra.mxu1 %v475_v9 }
  0x26   :  { %435 = vmatprep.subr.bf16.mxu1 %v514_v0  ;;  %452 = vmatpush3.bf16.msra.mxu0 %v482_v16 }
  0x27   :  { %453 = vmatprep.subr.bf16.mxu0 %v514_v0 }
  0x29   :  { %436 = vmatpush3.bf16.msra.mxu1 %v476_v10 }
  0x2a   :  { %437 = vmatprep.subr.bf16.mxu1 %v514_v0  ;;  %454 = vmatpush3.bf16.msra.mxu0 %v483_v17 }
  0x2b   :  { %455 = vmatprep.subr.bf16.mxu0 %v514_v0 }
  0x2d   :  { %438 = vmatpush3.bf16.msra.mxu1 %v477_v11 }
  0x2e   :  { %439 = vmatprep.subr.bf16.mxu1 %v514_v0  ;;  %456 = vmatpush3.bf16.msra.mxu0 %v484_v18 }
  0x2f   :  { %457 = vmatprep.subr.bf16.mxu0 %v514_v0 }
  0x31   :  { %440 = vmatpush3.bf16.msra.mxu1 %v478_v12 }
  0x32   :  { %458 = vmatpush3.bf16.msra.mxu0 %v485_v29 }
  0x33   :  { %459 = vmatprep.subr.bf16.mxu0 %v514_v0 }
  0x36   :  { %460 = vmatpush3.bf16.msra.mxu0 %v486_v30 }
  0xeb   :  { %v97_v20 = vpop.f32.mrb[0].mxu0 }
  0xec   :  { %v98_v21 = vadd.f32 %v378_v19, %v97_v20  ;;  %v423_v22 = vpop.f32.mrb[1].mxu0 }
  0xed   :  { %v100_v23 = vpop.f32.mrb[2].mxu0 }
  0xee   :  { %v101_v24 = vadd.f32 %v378_v19, %v100_v23  ;;  %v424_v25 = vpop.f32.mrb[3].mxu0  ;;  %v104_v26 = vmax.f32 %v98_v21, 0.0 }
  0xf0   :  { %v105_v27 = vmax.f32 %v101_v24, 0.0 }
  0xf2   :  { %v106_v28 = vpack.c.bf16 %v105_v27, %v104_v26 }
  0xf4   :  { %442 = vmatmul.mubr.bf16.vlgmr.msra.gmra.mrb[0].mxu1 %v106_v28 }
 0x1c7   :  { %v212_v32 = vpop.f32.mrb[0].mxu1 }
 0x1c8   :  { %v213_v33 = vadd.f32 %v381_v31, %v212_v32  ;;  %v443_v34 = vpop.f32.mrb[1].mxu1 }
 0x1c9   :  { %v215_v35 = vpop.f32.mrb[2].mxu1 }
 0x1ca   :  { %v216_v36 = vadd.f32 %v381_v31, %v215_v35  ;;  %v444_v37 = vpop.f32.mrb[3].mxu1  ;;  %v219_v38 = vmax.f32 %v213_v33, 0.0 }
 0x1cc   :  { %v220_v39 = vmax.f32 %v216_v36, 0.0 }
 0x1ce   :  { %v221_v40 = vpack.c.bf16 %v220_v39, %v219_v38 }
 0x1d0   :  { %462 = vmatmul.mubr.bf16.vlgmr.msra.gmra.mrb[4].mxu0 %v221_v40 }
 0x2a3   :  { %v327_v42 = vpop.f32.mrb[4].mxu0 }
 0x2a4   :  { %v328_v43 = vadd.f32 %v390_v41, %v327_v42  ;;  %v463_v44 = vpop.f32.mrb[5].mxu0 }
 0x2a5   :  { %v330_v45 = vpop.f32.mrb[6].mxu0 }
 0x2a6   :  { %335 = vst.msk [vmem:[#allocation4] sm:$0xff] %vm334_vm2, %v328_v43  ;;  %v464_v46 = vpop.f32.mrb[7].mxu0 }
 0x2ad   :  { %v366_v47 = vld [vmem:[#allocation4] sm:$0xff] }
 0x2ae   :  { %367 = vst [vmem:[%s664_s7] sm:$0xff] %v366_v47 }
 0x2af   :  { %373 = vsyncpa [#allocation3], 1 }

</bundles_post_ra>
